<compile_context>
chip_gen: v7x
topology: tpu7x:2x2x1
jax: 0.10.0
libtpu: 0.0.40
codegen_flags: <defaults>
</compile_context>

<pallas_src>
import functools

import jax
import jax.numpy as jnp
from jax import lax
from jax.experimental import pallas as pl
from jax.experimental.pallas import tpu as pltpu


def _round_up(x, n):
    return (x + n - 1) // n * n


def _vmem_cap_bytes():
    """Generation-aware VMEM budget: ~80% of per-core VMEM, safe fallback."""
    try:
        info = pltpu.get_tpu_info()
        cap = getattr(info, "vmem_capacity_bytes", None)
        if cap:
            return int(cap * 0.8)
    except Exception:
        pass
    return 48 << 20  # conservative: fits v7x's 64 MiB/TC with headroom


def _mlp_kernel(x_ref, w1_ref, b1_ref, w2_ref, b2_ref, o_ref, acc_ref,
                *, compute_dtype):
    """One (M-tile, hidden-tile) step of y = relu(x @ W1 + b1) @ W2 + b2.

    Grid axis 0: rows of x ("parallel" -> shards across TensorCores).
    Grid axis 1: hidden dimension ("arbitrary" -> reduction into acc_ref).
    """
    k = pl.program_id(1)

    @pl.when(k == 0)
    def _init():
        # Fold the output bias into the accumulator init (saves a finalize pass).
        acc_ref[...] = jnp.broadcast_to(b2_ref[...], acc_ref.shape)

    x = x_ref[...].astype(compute_dtype)
    h = jnp.dot(x, w1_ref[...], preferred_element_type=jnp.float32)   # MXU
    h = jnp.maximum(h + b1_ref[...], 0.0)                             # bias+ReLU (VPU, f32)
    acc_ref[...] += jnp.dot(h.astype(compute_dtype), w2_ref[...],
                            preferred_element_type=jnp.float32)       # MXU

    @pl.when(k == pl.num_programs(1) - 1)
    def _finalize():
        o_ref[...] = acc_ref[...].astype(o_ref.dtype)


def prepare_nonlinear_params(w1, b1, w2, b2, *, block_k=512,
                             compute_dtype=jnp.float32):
    """One-time weight prep (transpose + zero-pad + cast).

    Do this once at parameter-init time and reuse the result for every
    forward call; it is the only place weight-sized HBM copies happen.
    """
    hidden, in_dim = w1.shape
    out_dim = w2.shape[0]
    assert w2.shape == (out_dim, hidden)
    assert b1.shape == (hidden,) and b2.shape == (out_dim,)

    block_k = max(128, (block_k // 128) * 128)          # multiple of 128 lanes
    block_k = min(block_k, _round_up(hidden, 128))
    hid_p = _round_up(hidden, block_k)                  # zero-padded hidden: exact
    out_p = _round_up(out_dim, 128)                     # lane-dense output slab

    w1_t = jnp.pad(w1.T, ((0, 0), (0, hid_p - hidden))).astype(compute_dtype)
    w2_t = jnp.pad(w2.T, ((0, hid_p - hidden),
                          (0, out_p - out_dim))).astype(compute_dtype)
    b1_p = jnp.pad(b1.astype(jnp.float32), (0, hid_p - hidden)).reshape(1, hid_p)
    b2_p = jnp.pad(b2.astype(jnp.float32), (0, out_p - out_dim)).reshape(1, out_p)

    return dict(w1_t=w1_t, b1_p=b1_p, w2_t=w2_t, b2_p=b2_p,
                in_dim=in_dim, hidden=hidden, out_dim=out_dim,
                hid_p=hid_p, out_p=out_p, block_k=block_k,
                compute_dtype=compute_dtype)


def nonlinear_forward_prepared(x, params, *, block_m=512):
    """Fused Linear -> ReLU -> Linear using pre-prepared (padded) params."""
    m, in_dim = x.shape
    assert in_dim == params["in_dim"]
    out_dim, out_p = params["out_dim"], params["out_p"]
    hid_p, block_k = params["hid_p"], params["block_k"]
    compute_dtype = params["compute_dtype"]
    out_dtype = x.dtype

    cbytes = jnp.dtype(compute_dtype).itemsize
    xbytes = jnp.dtype(x.dtype).itemsize
    obytes = jnp.dtype(out_dtype).itemsize
    row_align = 8 if cbytes == 4 else 16                # sublane packing for bf16

    # Guarantee >=2 M-steps when there is enough work so the "parallel" grid
    # axis can shard across both TensorCores on v7x.
    half_m = _round_up(max(pl.cdiv(m, 2), 1), row_align)
    block_m = max(row_align, min(_round_up(block_m, row_align), half_m))

    cap = _vmem_cap_bytes()

    def est(bm):
        return int(2 * bm * in_dim * xbytes              # x tiles (double-buffered)
                   + 2 * in_dim * block_k * cbytes       # W1 tiles
                   + 2 * block_k * out_p * cbytes        # W2 tiles
                   + 2 * (block_k + out_p) * 4 * 2       # bias tiles (f32)
                   + 2 * bm * out_p * obytes             # out tiles
                   + bm * out_p * 4                      # f32 accumulator scratch
                   + bm * block_k * 4)                   # hidden activation

    while est(block_m) > int(0.85 * cap) and block_m > row_align:
        block_m = max(row_align, _round_up(block_m // 2, row_align))

    grid = (pl.cdiv(m, block_m), hid_p // block_k)
    vmem_limit = int(min(cap, max(2 * est(block_m) + (1 << 20), 16 << 20)))

    kernel = functools.partial(_mlp_kernel, compute_dtype=compute_dtype)
    y_p = pl.pallas_call(
        kernel,
        out_shape=jax.ShapeDtypeStruct((m, out_p), out_dtype),
        grid_spec=pltpu.PrefetchScalarGridSpec(
            num_scalar_prefetch=0,
            grid=grid,
            in_specs=[
                pl.BlockSpec((block_m, in_dim), lambda i, k: (i, 0)),  # x rows (no pad)
                pl.BlockSpec((in_dim, block_k), lambda i, k: (0, k)),  # W1^T hidden cols
                pl.BlockSpec((1, block_k), lambda i, k: (0, k)),       # b1 hidden slice
                pl.BlockSpec((block_k, out_p), lambda i, k: (k, 0)),   # W2^T hidden rows
                pl.BlockSpec((1, out_p), lambda i, k: (0, 0)),         # b2 (grid-invariant)
            ],
            out_specs=pl.BlockSpec((block_m, out_p), lambda i, k: (i, 0)),
            scratch_shapes=[pltpu.VMEM((block_m, out_p), jnp.float32)],
        ),
        compiler_params=pltpu.CompilerParams(
            dimension_semantics=("parallel", "arbitrary"),
            vmem_limit_bytes=vmem_limit),
    )(x, params["w1_t"], params["b1_p"], params["w2_t"], params["b2_p"])

    if out_p == out_dim:
        return y_p
    return lax.slice(y_p, (0, 0), (m, out_dim))


def nonlinear_forward(x, w1, b1, w2, b2, *, block_m=512, block_k=512,
                      compute_dtype=jnp.float32):
    """One-shot convenience wrapper. For repeated calls, prepare params once."""
    params = prepare_nonlinear_params(w1, b1, w2, b2, block_k=block_k,
                                      compute_dtype=compute_dtype)
    return nonlinear_forward_prepared(x, params, block_m=block_m)


def _xavier_uniform(key, shape, gain):
    # shape = (out_features, in_features), matching torch nn.Linear.weight
    fan_out, fan_in = shape
    bound = gain * (6.0 / (fan_in + fan_out)) ** 0.5
    return jax.random.uniform(key, shape, jnp.float32, minval=-bound, maxval=bound)


if __name__ == "__main__":
    # Small shapes consistent with the module: input=32, hidden=64, output=16.
    # batch=200 with the default block_m exercises a 2-step parallel M grid
    # (both TensorCores on v7x), a partial last M block, and the lane-padded
    # output slab + slice.
    input_dim, hidden_dim, output_dim = 32, 64, 16
    batch = 200

    key = jax.random.PRNGKey(0)
    kx, kw1, kw2 = jax.random.split(key, 3)

    gain = 2.0 ** 0.5  # nn.init.calculate_gain('relu')
    w1 = _xavier_uniform(kw1, (hidden_dim, input_dim), gain)   # torch layout
    b1 = jnp.zeros((hidden_dim,), jnp.float32)
    w2 = _xavier_uniform(kw2, (output_dim, hidden_dim), gain)
    b2 = jnp.zeros((output_dim,), jnp.float32)

    x = jax.random.normal(kx, (batch, input_dim), jnp.float32)

    # One-time weight preparation (transpose/pad), reused across forward calls.
    params = prepare_nonlinear_params(w1, b1, w2, b2)
    y = nonlinear_forward_prepared(x, params)
    y = jax.block_until_ready(y)

    # Pure-JAX reference (PyTorch semantics: x @ W.T + b).
    ref = jnp.maximum(x @ w1.T + b1, 0.0) @ w2.T + b2
    assert y.shape == (batch, output_dim)
    assert jnp.allclose(y, ref, atol=1e-5, rtol=1e-5), float(jnp.max(jnp.abs(y - ref)))

    print("KERNEL_OK")
</pallas_src>

<mosaic_0001>
module attributes {stable_mosaic.version = 11 : i64} {
  func.func @_mlp_kernel(%arg0: i32, %arg1: i32, %arg2: memref<104x32xf32, #tpu.memory_space<vmem>>, %arg3: memref<32x128xf32, #tpu.memory_space<vmem>>, %arg4: memref<1x128xf32, #tpu.memory_space<vmem>>, %arg5: memref<128x128xf32, #tpu.memory_space<vmem>>, %arg6: memref<1x128xf32, #tpu.memory_space<vmem>>, %arg7: memref<104x128xf32, #tpu.memory_space<vmem>>, %arg8: memref<104x128xf32, #tpu.memory_space<vmem>>) attributes {dimension_semantics = [#tpu.dimension_semantics<parallel>, #tpu.dimension_semantics<arbitrary>], iteration_bounds = array<i64: 2, 1>, scalar_prefetch = 0 : i64, scratch_operands = 1 : i64, tpu.core_type = #tpu.core_type<tc>, window_params = [{transform_indices = @transform_0, window_bounds = array<i64: 104, 32>}, {transform_indices = @transform_1, window_bounds = array<i64: 32, 128>}, {transform_indices = @transform_2, window_bounds = array<i64: 1, 128>}, {transform_indices = @transform_3, window_bounds = array<i64: 128, 128>}, {pipeline_mode = #tpu.pipeline_mode<synchronous>, transform_indices = @transform_4, window_bounds = array<i64: 1, 128>}, {transform_indices = @transform_5, window_bounds = array<i64: 104, 128>}]} {
    %c0_i32 = arith.constant 0 : i32
    %0 = arith.cmpi eq, %arg1, %c0_i32 : i32
    %1 = arith.extui %0 : i1 to i32
    %c0_i32_0 = arith.constant 0 : i32
    %2 = arith.cmpi ne, %1, %c0_i32_0 : i32
    scf.if %2 {
      %c0_16 = arith.constant 0 : index
      %c0_17 = arith.constant 0 : index
      %19 = vector.load %arg6[%c0_16, %c0_17] : memref<1x128xf32, #tpu.memory_space<vmem>>, vector<1x128xf32>
      %20 = vector.shape_cast %19 : vector<1x128xf32> to vector<1x128xf32>
      %21 = vector.broadcast %20 : vector<1x128xf32> to vector<104x128xf32>
      %c0_18 = arith.constant 0 : index
      %c0_19 = arith.constant 0 : index
      %22 = vector.load %arg8[%c0_18, %c0_19] : memref<104x128xf32, #tpu.memory_space<vmem>>, vector<104x128xf32>
      tpu.vector_store %arg8[%c0_18, %c0_19], %21 {strides = array<i32>} : memref<104x128xf32, #tpu.memory_space<vmem>>, vector<104x128xf32>,
    } else {
    }
    %c0 = arith.constant 0 : index
    %c0_1 = arith.constant 0 : index
    %3 = vector.load %arg2[%c0, %c0_1] : memref<104x32xf32, #tpu.memory_space<vmem>>, vector<104x32xf32>
    %c0_2 = arith.constant 0 : index
    %c0_3 = arith.constant 0 : index
    %4 = vector.load %arg3[%c0_2, %c0_3] : memref<32x128xf32, #tpu.memory_space<vmem>>, vector<32x128xf32>
    %cst = arith.constant dense<0.000000e+00> : vector<104x128xf32>
    %5 = tpu.matmul %3, %4, %cst {dimension_numbers = #tpu.dot_dimension_numbers<[1], [0], [0], [1], [0, 0, 1, 1], [], []>} : vector<104x32xf32>, vector<32x128xf32>, vector<104x128xf32> -> vector<104x128xf32>
    %c0_4 = arith.constant 0 : index
    %c0_5 = arith.constant 0 : index
    %6 = vector.load %arg4[%c0_4, %c0_5] : memref<1x128xf32, #tpu.memory_space<vmem>>, vector<1x128xf32>
    %7 = vector.broadcast %6 : vector<1x128xf32> to vector<104x128xf32>
    %8 = arith.addf %5, %7 : vector<104x128xf32>
    %cst_6 = arith.constant 0.000000e+00 : f32
    %9 = vector.broadcast %cst_6 : f32 to vector<104x128xf32>
    %10 = arith.maximumf %8, %9 : vector<104x128xf32>
    %c0_7 = arith.constant 0 : index
    %c0_8 = arith.constant 0 : index
    %11 = vector.load %arg8[%c0_7, %c0_8] : memref<104x128xf32, #tpu.memory_space<vmem>>, vector<104x128xf32>
    %c0_9 = arith.constant 0 : index
    %c0_10 = arith.constant 0 : index
    %12 = vector.load %arg5[%c0_9, %c0_10] : memref<128x128xf32, #tpu.memory_space<vmem>>, vector<128x128xf32>
    %cst_11 = arith.constant dense<0.000000e+00> : vector<104x128xf32>
    %13 = tpu.matmul %10, %12, %cst_11 {dimension_numbers = #tpu.dot_dimension_numbers<[1], [0], [0], [1], [0, 0, 1, 1], [], []>} : vector<104x128xf32>, vector<128x128xf32>, vector<104x128xf32> -> vector<104x128xf32>
    %14 = arith.addf %11, %13 : vector<104x128xf32>
    %c0_12 = arith.constant 0 : index
    %c0_13 = arith.constant 0 : index
    %15 = vector.load %arg8[%c0_12, %c0_13] : memref<104x128xf32, #tpu.memory_space<vmem>>, vector<104x128xf32>
    tpu.vector_store %arg8[%c0_12, %c0_13], %14 {strides = array<i32>} : memref<104x128xf32, #tpu.memory_space<vmem>>, vector<104x128xf32>,
    %c0_i32_14 = arith.constant 0 : i32
    %16 = arith.cmpi eq, %arg1, %c0_i32_14 : i32
    %17 = arith.extui %16 : i1 to i32
    %c0_i32_15 = arith.constant 0 : i32
    %18 = arith.cmpi ne, %17, %c0_i32_15 : i32
    scf.if %18 {
      %c0_16 = arith.constant 0 : index
      %c0_17 = arith.constant 0 : index
      %19 = vector.load %arg8[%c0_16, %c0_17] : memref<104x128xf32, #tpu.memory_space<vmem>>, vector<104x128xf32>
      %c0_18 = arith.constant 0 : index
      %c0_19 = arith.constant 0 : index
      %20 = vector.load %arg7[%c0_18, %c0_19] : memref<104x128xf32, #tpu.memory_space<vmem>>, vector<104x128xf32>
      tpu.vector_store %arg7[%c0_18, %c0_19], %19 {strides = array<i32>} : memref<104x128xf32, #tpu.memory_space<vmem>>, vector<104x128xf32>,
    } else {
    }
    return
  }
  func.func @transform_0(%arg0: i32, %arg1: i32) -> (i32, i32) {
    %c0_i32 = arith.constant 0 : i32
    %c0_i32_0 = arith.constant 0 : i32
    return %arg0, %c0_i32 : i32, i32
  }
  func.func @transform_1(%arg0: i32, %arg1: i32) -> (i32, i32) {
    %c0_i32 = arith.constant 0 : i32
    %c0_i32_0 = arith.constant 0 : i32
    return %c0_i32, %arg1 : i32, i32
  }
  func.func @transform_2(%arg0: i32, %arg1: i32) -> (i32, i32) {
    %c0_i32 = arith.constant 0 : i32
    %c0_i32_0 = arith.constant 0 : i32
    return %c0_i32, %arg1 : i32, i32
  }
  func.func @transform_3(%arg0: i32, %arg1: i32) -> (i32, i32) {
    %c0_i32 = arith.constant 0 : i32
    %c0_i32_0 = arith.constant 0 : i32
    return %arg1, %c0_i32 : i32, i32
  }
  func.func @transform_4(%arg0: i32, %arg1: i32) -> (i32, i32) {
    %c0_i32 = arith.constant 0 : i32
    %c0_i32_0 = arith.constant 0 : i32
    %c0_i32_1 = arith.constant 0 : i32
    return %c0_i32, %c0_i32_0 : i32, i32
  }
  func.func @transform_5(%arg0: i32, %arg1: i32) -> (i32, i32) {
    %c0_i32 = arith.constant 0 : i32
    %c0_i32_0 = arith.constant 0 : i32
    return %arg0, %c0_i32 : i32, i32
  }
}

</mosaic_0001>

<bundles_post_ra>
// kernel: tpu_custom_call.1
= control target key start
LH: loop header
LB: loop body
LE: loop exit
PB: predicated region body
PF: predicated region fallthrough
CT: control target
= control target key end

     0   :  { %10 = vsyncpa [#allocation4], 0  ;;  %s1638_s0 = inlined_call_operand.vmem [shape: f32[200,32], index: 0, kind: input, shape index: {}]   ;;  %s1639_s1 = inlined_call_operand.vmem [shape: f32[32,128], index: 1, kind: input, shape index: {}]   ;;  %s1640_s2 = inlined_call_operand.vmem [shape: f32[1,128], index: 2, kind: input, shape index: {}]   ;;  %s1641_s3 = inlined_call_operand.vmem [shape: f32[128,128], index: 3, kind: input, shape index: {}]   ;;  %s1642_s4 = inlined_call_operand.vmem [shape: f32[1,128], index: 4, kind: input, shape index: {}]   ;;  %s1643_s5 = inlined_call_operand.hbm [shape: f32[200,128], index: 5, kind: output, shape index: {}]  }
   0x1   :  { %12 = vsyncpa [#allocation4 + $0x1], 0  ;;  %s1310_s18 = smov 0   ;;  %s1312_s19 = smov 0  }
   0x2   :  { %s1314_s20 = smov 0   ;;  %s1316_s21 = smov 0  }
   0x3   :  { %s1318_s22 = smov 0   ;;  %s1320_s23 = smov 0  }
   0x4 LB: > { %s892_s24 = sadd.s32 4294967295, %s1272_s23   ;;  %s893_s25 = sadd.s32 4294967294, %s1272_s23   ;;  %s1272_s23 = sphi %s1320_s23, %s18_s23   ;;  %s1268_s22 = sphi %s1318_s22, %s1650_s22   ;;  %s1264_s21 = sphi %s1316_s21, %s1649_s21   ;;  %s1260_s20 = sphi %s1314_s20, %s1648_s20   ;;  %s1256_s19 = sphi %s1312_s19, %s1647_s19   ;;  %s1252_s18 = sphi %s1310_s18, %s1646_s18  }
   0x5   : > { %s30_s26 = sadd.s32 1, %s1268_s22  ;;  %s162_s27 = sadd.s32 1, %s1260_s20 }
   0x6   : > { %p32_p0 = scmp.ge.s32.totalorder %s30_s26, 2  ;;  %p172_p1 = scmp.ne.s32.totalorder %s1260_s20, %s1256_s19 }
   0x7   : > { %p173_p2 = scmp.eq.s32.totalorder %s892_s24, 1  ;;  %p178_p3 = scmp.ne.s32.totalorder %s1256_s19, %s1252_s18 }
   0x8   : > { %s1652_s26 = smov (%p32_p0, %s30_s26), 0  ;;  %p179_p5 = scmp.eq.s32.totalorder %s893_s25, 1 }
   0x9   : > { %p1350_p4 = por %p173_p2, %p172_p1  ;;  %s159_s29 = ssub.s32 %s1268_s22, %s1652_s26 }
   0xa   : > { %p899_p6 = scmp.ge.s32.totalorder %s1272_s23, 1  ;;  %p160_p7 = scmp.eq.s32.totalorder %s159_s29, 0 }
   0xb   : > { %p1357_p8 = por %p179_p5, %p178_p3  ;;  %p239_p9 = scmp.lt.s32.totalorder %s1272_s23, 3 }
   0xc   : > { %s1363_s6 = scalar_select %p160_p7, %s1260_s20, %s162_s27  }
   0xd   : > { %p240_p10 = pnand %p899_p6, %p239_p9 }
   0xe   : > { %v352_v0 = vld [vmem:[%s1639_s1] sm:$0xff] (!%p240_p10)  ;;  %v353_v1 = vld [vmem:[%s1639_s1 + $0x8] sm:$0xff] (!%p240_p10)  ;;  %v354_v2 = vld [vmem:[%s1639_s1 + $0x10] sm:$0xff] (!%p240_p10)  ;;  %v1274_v3 = vmov (!%p240_p10), 0.0|0.0   ;;  %vm1275_vm0 = vmmov (!%p240_p10), 0   ;;  %v1276_v6 = vmov (!%p240_p10), 0.0  }
   0xf   : > { %243 = sbr.rel (%p240_p10) target bundleno = 534 (0x216), region = 40  ;;  %1088 = vmatprep.subr.bf16.mxu0 (!%p240_p10), %v1274_v3  ;;  %v1089_v4 = vpack.c.bf16 (!%p240_p10), %v353_v1, %v352_v0  ;;  %v355_v5 = vld [vmem:[%s1639_s1 + $0x18] sm:$0xff] (!%p240_p10)  ;;  %978 = vmatprep.mubr.msk.f32.mxu0 (!%p240_p10), %vm1275_vm0, %v1276_v6  ;;  %v559_v7 = vld [vmem:[%s1641_s3] sm:$0xff] (!%p240_p10)  ;;  %v560_v8 = vld [vmem:[%s1641_s3 + $0x8] sm:$0xff] (!%p240_p10)  ;;  %vm363_vm1 = vcmask (!%p240_p10), 261120  }
  0x10   : > { %s1381_s15 = smul.u32 (!%p240_p10), 13, %s1264_s21  ;;  %v1095_v9 = vpack.c.bf16 (!%p240_p10), %v560_v8, %v559_v7  ;;  %1118 = vmatprep.subr.bf16.mxu1 (!%p240_p10), %v1274_v3  ;;  %1058 = vmatprep.mubr.msk.f32.mxu1 (!%p240_p10), %vm1275_vm0, %v1276_v6  ;;  %v1092_v10 = vpack.c.bf16 (!%p240_p10), %v355_v5, %v354_v2  ;;  %v561_v11 = vld [vmem:[%s1641_s3 + $0x10] sm:$0xff] (!%p240_p10)  ;;  %v562_v12 = vld [vmem:[%s1641_s3 + $0x18] sm:$0xff] (!%p240_p10)  ;;  %v563_v14 = vld [vmem:[%s1641_s3 + $0x20] sm:$0xff] (!%p240_p10) }
  0x11   : > { %1090 = vmatpush3.bf16.msra.mxu0 (!%p240_p10), %v1089_v4  ;;  %v1098_v13 = vpack.c.bf16 (!%p240_p10), %v562_v12, %v561_v11  ;;  %v564_v15 = vld [vmem:[%s1641_s3 + $0x28] sm:$0xff] (!%p240_p10)  ;;  %v565_v19 = vld [vmem:[%s1641_s3 + $0x30] sm:$0xff] (!%p240_p10)  ;;  %v566_v20 = vld [vmem:[%s1641_s3 + $0x38] sm:$0xff] (!%p240_p10) }
  0x12   : > { %p288_p11 = scmp.lt.s32.totalorder (!%p240_p10), %s1381_s15, 24  ;;  %1091 = vmatprep.subr.bf16.mxu0 (!%p240_p10), %v1274_v3  ;;  %1126 = vmatpush3.bf16.msra.mxu1 (!%p240_p10), %v1095_v9  ;;  %v1101_v17 = vpack.c.bf16 (!%p240_p10), %v564_v15, %v563_v14  ;;  %v1104_v21 = vpack.c.bf16 (!%p240_p10), %v566_v20, %v565_v19  ;;  %v567_v23 = vld [vmem:[%s1641_s3 + $0x40] sm:$0xff] (!%p240_p10)  ;;  %v568_v24 = vld [vmem:[%s1641_s3 + $0x48] sm:$0xff] (!%p240_p10)  ;;  %v569_v27 = vld [vmem:[%s1641_s3 + $0x50] sm:$0xff] (!%p240_p10) }
  0x13   : > { %1119 = vmatprep.subr.bf16.mxu1 (!%p240_p10), %v1274_v3  ;;  %v1107_v25 = vpack.c.bf16 (!%p240_p10), %v568_v24, %v567_v23  ;;  %v570_v28 = vld [vmem:[%s1641_s3 + $0x58] sm:$0xff] (!%p240_p10)  ;;  %v571_v31 = vld [vmem:[%s1641_s3 + $0x60] sm:$0xff] (!%p240_p10)  ;;  %v572_v32 = vld [vmem:[%s1641_s3 + $0x68] sm:$0xff] (!%p240_p10) }
  0x14   : > { %v1110_v29 = vpack.c.bf16 (!%p240_p10), %v570_v28, %v569_v27  ;;  %v1113_v33 = vpack.c.bf16 (!%p240_p10), %v572_v32, %v571_v31  ;;  %v573_v42 = vld [vmem:[%s1641_s3 + $0x70] sm:$0xff] (!%p240_p10)  ;;  %v574_v43 = vld [vmem:[%s1641_s3 + $0x78] sm:$0xff] (!%p240_p10)  ;;  %v1512_v45 = vld [vmem:[%s1640_s2] ss:$0 sm:$0xff] (!%p240_p10) }
  0x15   : > { %1093 = vmatpush3.bf16.msra.mxu0 (!%p240_p10), %v1092_v10  ;;  %v1116_v44 = vpack.c.bf16 (!%p240_p10), %v574_v43, %v573_v42 }
  0x16   : > { %s289_s9 = scalar_select %p288_p11, %s1381_s15, 24  ;;  %1094 = vmatprep.subr.bf16.mxu0 %v1274_v3  ;;  %1127 = vmatpush3.bf16.msra.mxu1 %v1098_v13 }
  0x17   : > { %1120 = vmatprep.subr.bf16.mxu1 %v1274_v3  ;;  %s769_s27 = ssub.s32 (%p1350_p4), 25, %s1381_s15 }
  0x18   : > { %s900_s10 = sshll.u32 %s289_s9, 3  ;;  %p770_p12 = scmp.lt.s32.totalorder (%p1350_p4), %s769_s27, 13 }
  0x19   : > { %s1411_s24 = scalar_lea.vmem %s1638_s0, %s900_s10 }
  0x1a   : > { %v339_v16 = vld [vmem:[%s1411_s24] sm:$0xff]  ;;  %v340_v18 = vld [vmem:[%s1411_s24 + $0x8] sm:$0xff]  ;;  %1128 = vmatpush3.bf16.msra.mxu1 %v1101_v17  ;;  %v341_v22 = vld [vmem:[%s1411_s24 + $0x10] sm:$0xff] }
  0x1b   : > { %979 = vmatmul.mubr.msk.f32.vlgmr.msra.gmra.mrb[0].mxu0 %vm363_vm1, %v339_v16  ;;  %1121 = vmatprep.subr.bf16.mxu1 %v1274_v3  ;;  %v342_v26 = vld [vmem:[%s1411_s24 + $0x18] sm:$0xff]  ;;  %v343_v30 = vld [vmem:[%s1411_s24 + $0x20] sm:$0xff]  ;;  %v344_v34 = vld [vmem:[%s1411_s24 + $0x28] sm:$0xff] }
  0x1c   : > { %981 = vmatprep.mubr.msk.f32.mxu0 %vm1275_vm0, %v1276_v6  ;;  %1096 = vmatpush3.bf16.msra.mxu0 %v1095_v9  ;;  %v345_v35 = vld [vmem:[%s1411_s24 + $0x30] sm:$0xff]  ;;  %v346_v36 = vld [vmem:[%s1411_s24 + $0x38] sm:$0xff]  ;;  %v347_v37 = vld [vmem:[%s1411_s24 + $0x40] sm:$0xff] }
  0x1d   : > { %1097 = vmatprep.subr.bf16.mxu0 %v1274_v3  ;;  %v348_v38 = vld [vmem:[%s1411_s24 + $0x48] sm:$0xff]  ;;  %v349_v39 = vld [vmem:[%s1411_s24 + $0x50] sm:$0xff]  ;;  %v350_v40 = vld [vmem:[%s1411_s24 + $0x58] sm:$0xff] }
  0x1e   : > { %1129 = vmatpush3.bf16.msra.mxu1 %v1104_v21  ;;  %v351_v41 = vld [vmem:[%s1411_s24 + $0x60] sm:$0xff]  ;;  %s280_s24 = sand.u32 1, %s1256_s19  }
  0x1f   : > { %982 = vmatmul.mubr.msk.f32.gmra.mrb[2].mxu0 %vm363_vm1, %v340_v18  ;;  %1122 = vmatprep.subr.bf16.mxu1 %v1274_v3  ;;  %s1134_s13 = smul.u32 104, %s280_s24  ;;  %s1572_s25 = scalar_lea.sflag [#allocation4], %s280_s24 }
  0x20   : > { %984 = vmatprep.mubr.msk.f32.mxu0 %vm1275_vm0, %v1276_v6  ;;  %1099 = vmatpush3.bf16.msra.mxu0 %v1098_v13 }
  0x21   : > { %1100 = vmatprep.subr.bf16.mxu0 %v1274_v3  ;;  %s1555_s17 = scalar_lea.vmem [#allocation3], %s1134_s13 }
  0x22   : > { %1130 = vmatpush3.bf16.msra.mxu1 %v1107_v25 }
  0x23   : > { %985 = vmatmul.mubr.msk.f32.gmra.mrb[4].mxu0 %vm363_vm1, %v341_v22  ;;  %1123 = vmatprep.subr.bf16.mxu1 %v1274_v3 }
  0x24   : > { %987 = vmatprep.mubr.msk.f32.mxu0 %vm1275_vm0, %v1276_v6  ;;  %1102 = vmatpush3.bf16.msra.mxu0 %v1101_v17 }
  0x25   : > { %1103 = vmatprep.subr.bf16.mxu0 %v1274_v3 }
  0x26   : > { %1131 = vmatpush3.bf16.msra.mxu1 %v1110_v29 }
  0x27   : > { %988 = vmatmul.mubr.msk.f32.gmra.mrb[6].mxu0 %vm363_vm1, %v342_v26  ;;  %1124 = vmatprep.subr.bf16.mxu1 %v1274_v3 }
  0x28   : > { %990 = vmatprep.mubr.msk.f32.mxu0 %vm1275_vm0, %v1276_v6  ;;  %1105 = vmatpush3.bf16.msra.mxu0 %v1104_v21 }
  0x29   : > { %1106 = vmatprep.subr.bf16.mxu0 %v1274_v3 }
  0x2a   : > { %1132 = vmatpush3.bf16.msra.mxu1 %v1113_v33 }
  0x2b   : > { %991 = vmatmul.mubr.msk.f32.gmra.mrb[8].mxu0 %vm363_vm1, %v343_v30  ;;  %1125 = vmatprep.subr.bf16.mxu1 %v1274_v3 }
  0x2c   : > { %993 = vmatprep.mubr.msk.f32.mxu0 %vm1275_vm0, %v1276_v6  ;;  %1108 = vmatpush3.bf16.msra.mxu0 %v1107_v25 }
  0x2d   : > { %1109 = vmatprep.subr.bf16.mxu0 %v1274_v3 }
  0x2e   : > { %1133 = vmatpush3.bf16.msra.mxu1 %v1116_v44 }
  0x2f   : > { %994 = vmatmul.mubr.msk.f32.gmra.mrb[10].mxu0 %vm363_vm1, %v344_v34 }
  0x30   : > { %996 = vmatprep.mubr.msk.f32.mxu0 %vm1275_vm0, %v1276_v6  ;;  %1111 = vmatpush3.bf16.msra.mxu0 %v1110_v29 }
  0x31   : > { %1112 = vmatprep.subr.bf16.mxu0 %v1274_v3 }
  0x33   : > { %997 = vmatmul.mubr.msk.f32.gmra.mrb[12].mxu0 %vm363_vm1, %v345_v35  ;;  %v901_v35 = vld [vmem:[%s1642_s4] ss:$0 sm:$0xff] }
  0x34   : > { %999 = vmatprep.mubr.msk.f32.mxu0 %vm1275_vm0, %v1276_v6  ;;  %1114 = vmatpush3.bf16.msra.mxu0 %v1113_v33 }
  0x35   : > { %1115 = vmatprep.subr.bf16.mxu0 %v1274_v3 }
  0x37   : > { %1000 = vmatmul.mubr.msk.f32.gmra.mrb[14].mxu0 %vm363_vm1, %v346_v36 }
  0x38   : > { %1002 = vmatprep.mubr.msk.f32.mxu0 %vm1275_vm0, %v1276_v6  ;;  %1117 = vmatpush3.bf16.msra.mxu0 %v1116_v44 }
  0x3b   : > { %1003 = vmatmul.mubr.msk.f32.gmra.mrb[16].mxu0 %vm363_vm1, %v347_v37 }
  0x3c   : > { %1005 = vmatprep.mubr.msk.f32.mxu0 %vm1275_vm0, %v1276_v6 }
  0x3f   : > { %1006 = vmatmul.mubr.msk.f32.gmra.mrb[18].mxu0 %vm363_vm1, %v348_v38 }
  0x40   : > { %1008 = vmatprep.mubr.msk.f32.mxu0 %vm1275_vm0, %v1276_v6 }
  0x43   : > { %1009 = vmatmul.mubr.msk.f32.gmra.mrb[20].mxu0 %vm363_vm1, %v349_v39 }
  0x44   : > { %1011 = vmatprep.mubr.msk.f32.mxu0 %vm1275_vm0, %v1276_v6 }
  0x47   : > { %1012 = vmatmul.mubr.msk.f32.gmra.mrb[22].mxu0 %vm363_vm1, %v350_v40 }
  0x48   : > { %1014 = vmatprep.mubr.msk.f32.mxu0 %vm1275_vm0, %v1276_v6 }
  0x4b   : > { %1015 = vmatmul.mubr.msk.f32.gmra.mrb[24].mxu0 %vm363_vm1, %v351_v41 }
  0x4c   : > { %1049 = vmatprep.mubr.msk.f32.mxu0 %vm1275_vm0, %v1276_v6 }
  0xee   : > { %v469_v46 = vpop.f32.mrb[0].mxu0 }
  0xef   : > { %v470_v47 = vadd.f32 %v1512_v45, %v469_v46  ;;  %v980_v48 = vpop.f32.mrb[1].mxu0 }
  0xf1   : > { %v533_v49 = vmax.f32 %v470_v47, 0.0 }
  0xf2   : > { %v474_v50 = vpop.f32.mrb[2].mxu0 }
  0xf3   : > { %v475_v51 = vadd.f32 %v1512_v45, %v474_v50  ;;  %v983_v52 = vpop.f32.mrb[3].mxu0  ;;  %1050 = vmatmul.mubr.f32.vlgmr.msra.gmra.mrb[26].mxu0 %v533_v49 }
  0xf4   : > { %1052 = vmatprep.mubr.msk.f32.mxu0 %vm1275_vm0, %v1276_v6 }
  0xf5   : > { %v534_v53 = vmax.f32 %v475_v51, 0.0 }
  0xf6   : > { %v479_v54 = vpop.f32.mrb[4].mxu0 }
  0xf7   : > { %v480_v55 = vadd.f32 %v1512_v45, %v479_v54  ;;  %v986_v56 = vpop.f32.mrb[5].mxu0  ;;  %1053 = vmatmul.mubr.f32.gmra.mrb[28].mxu0 %v534_v53 }
  0xf8   : > { %1055 = vmatprep.mubr.msk.f32.mxu0 %vm1275_vm0, %v1276_v6 }
  0xf9   : > { %v535_v57 = vmax.f32 %v480_v55, 0.0 }
  0xfa   : > { %v484_v58 = vpop.f32.mrb[6].mxu0 }
  0xfb   : > { %v485_v59 = vadd.f32 %v1512_v45, %v484_v58  ;;  %v989_v60 = vpop.f32.mrb[7].mxu0  ;;  %1056 = vmatmul.mubr.f32.gmra.mrb[30].mxu0 %v535_v57 }
  0xfd   : > { %v536_v61 = vmax.f32 %v485_v59, 0.0 }
  0xfe   : > { %v489_v62 = vpop.f32.mrb[8].mxu0 }
  0xff   : > { %v490_v63 = vadd.f32 %v1512_v45, %v489_v62  ;;  %v992_v0 = vpop.f32.mrb[9].mxu0  ;;  %1059 = vmatmul.mubr.f32.vlgmr.msra.gmra.mrb[0].mxu1 %v536_v61 }
 0x100   : > { %1061 = vmatprep.mubr.msk.f32.mxu1 %vm1275_vm0, %v1276_v6 }
 0x101   : > { %v537_v1 = vmax.f32 %v490_v63, 0.0 }
 0x102   : > { %v494_v2 = vpop.f32.mrb[10].mxu0 }
 0x103   : > { %v495_v3 = vadd.f32 %v1512_v45, %v494_v2  ;;  %v995_v4 = vpop.f32.mrb[11].mxu0  ;;  %1062 = vmatmul.mubr.f32.gmra.mrb[2].mxu1 %v537_v1 }
 0x104   : > { %1064 = vmatprep.mubr.msk.f32.mxu1 %vm1275_vm0, %v1276_v6 }
 0x105   : > { %v538_v5 = vmax.f32 %v495_v3, 0.0 }
 0x106   : > { %v499_v7 = vpop.f32.mrb[12].mxu0 }
 0x107   : > { %v500_v8 = vadd.f32 %v1512_v45, %v499_v7  ;;  %v998_v9 = vpop.f32.mrb[13].mxu0  ;;  %1065 = vmatmul.mubr.f32.gmra.mrb[4].mxu1 %v538_v5 }
 0x108   : > { %1067 = vmatprep.mubr.msk.f32.mxu1 %vm1275_vm0, %v1276_v6 }
 0x109   : > { %v539_v10 = vmax.f32 %v500_v8, 0.0 }
 0x10a   : > { %v504_v11 = vpop.f32.mrb[14].mxu0 }
 0x10b   : > { %v505_v12 = vadd.f32 %v1512_v45, %v504_v11  ;;  %v1001_v13 = vpop.f32.mrb[15].mxu0  ;;  %1068 = vmatmul.mubr.f32.gmra.mrb[6].mxu1 %v539_v10 }
 0x10c   : > { %1070 = vmatprep.mubr.msk.f32.mxu1 %vm1275_vm0, %v1276_v6 }
 0x10d   : > { %v540_v14 = vmax.f32 %v505_v12, 0.0 }
 0x10e   : > { %v509_v15 = vpop.f32.mrb[16].mxu0 }
 0x10f   : > { %v510_v16 = vadd.f32 %v1512_v45, %v509_v15  ;;  %v1004_v17 = vpop.f32.mrb[17].mxu0  ;;  %1071 = vmatmul.mubr.f32.gmra.mrb[8].mxu1 %v540_v14 }
 0x110   : > { %1073 = vmatprep.mubr.msk.f32.mxu1 %vm1275_vm0, %v1276_v6 }
 0x111   : > { %v541_v18 = vmax.f32 %v510_v16, 0.0 }
 0x112   : > { %v514_v19 = vpop.f32.mrb[18].mxu0 }
 0x113   : > { %v515_v20 = vadd.f32 %v1512_v45, %v514_v19  ;;  %v1007_v21 = vpop.f32.mrb[19].mxu0  ;;  %1074 = vmatmul.mubr.f32.gmra.mrb[10].mxu1 %v541_v18 }
 0x114   : > { %1076 = vmatprep.mubr.msk.f32.mxu1 %vm1275_vm0, %v1276_v6 }
 0x115   : > { %v542_v22 = vmax.f32 %v515_v20, 0.0 }
 0x116   : > { %v519_v23 = vpop.f32.mrb[20].mxu0 }
 0x117   : > { %v520_v24 = vadd.f32 %v1512_v45, %v519_v23  ;;  %v1010_v25 = vpop.f32.mrb[21].mxu0  ;;  %1077 = vmatmul.mubr.f32.gmra.mrb[12].mxu1 %v542_v22 }
 0x118   : > { %1079 = vmatprep.mubr.msk.f32.mxu1 %vm1275_vm0, %v1276_v6 }
 0x119   : > { %v543_v26 = vmax.f32 %v520_v24, 0.0 }
 0x11a   : > { %v524_v27 = vpop.f32.mrb[22].mxu0 }
 0x11b   : > { %v525_v28 = vadd.f32 %v1512_v45, %v524_v27  ;;  %v1013_v29 = vpop.f32.mrb[23].mxu0  ;;  %1080 = vmatmul.mubr.f32.gmra.mrb[14].mxu1 %v543_v26 }
 0x11c   : > { %1082 = vmatprep.mubr.msk.f32.mxu1 %vm1275_vm0, %v1276_v6 }
 0x11d   : > { %v544_v30 = vmax.f32 %v525_v28, 0.0 }
 0x11e   : > { %v529_v31 = vpop.f32.mrb[24].mxu0 }
 0x11f   : > { %v530_v32 = vadd.f32 %v1512_v45, %v529_v31  ;;  %v1016_v33 = vpop.f32.mrb[25].mxu0  ;;  %1083 = vmatmul.mubr.f32.gmra.mrb[16].mxu1 %v544_v30 }
 0x120   : > { %1085 = vmatprep.mubr.msk.f32.mxu1 %vm1275_vm0, %v1276_v6 }
 0x121   : > { %v545_v34 = vmax.f32 %v530_v32, 0.0 }
 0x123   : > { %1086 = vmatmul.mubr.f32.gmra.mrb[18].mxu1 %v545_v34 }
 0x1c6   : > { %v641_v36 = vpop.f32.mrb[26].mxu0 }
 0x1c7   : > { %v705_v37 = vadd.f32 %v901_v35, %v641_v36  ;;  %v1051_v38 = vpop.f32.mrb[27].mxu0 }
 0x1c9   : > { %747 = vst [vmem:[%s1555_s17] sm:$0xff] %v705_v37 }
 0x1ca   : > { %v646_v6 = vpop.f32.mrb[28].mxu0 }
 0x1cb   : > { %v706_v39 = vadd.f32 %v901_v35, %v646_v6  ;;  %v1054_v40 = vpop.f32.mrb[29].mxu0 }
 0x1cd   : > { %748 = vst [vmem:[%s1555_s17 + $0x8] sm:$0xff] %v706_v39 }
 0x1ce   : > { %v651_v41 = vpop.f32.mrb[30].mxu0 }
 0x1cf   : > { %v707_v42 = vadd.f32 %v901_v35, %v651_v41  ;;  %v1057_v43 = vpop.f32.mrb[31].mxu0 }
 0x1d1   : > { %749 = vst [vmem:[%s1555_s17 + $0x10] sm:$0xff] %v707_v42 }
 0x1d2   : > { %v656_v44 = vpop.f32.mrb[0].mxu1 }
 0x1d3   : > { %v708_v45 = vadd.f32 %v901_v35, %v656_v44  ;;  %v1060_v46 = vpop.f32.mrb[1].mxu1 }
 0x1d5   : > { %750 = vst [vmem:[%s1555_s17 + $0x18] sm:$0xff] %v708_v45 }
 0x1d6   : > { %v661_v47 = vpop.f32.mrb[2].mxu1 }
 0x1d7   : > { %v709_v48 = vadd.f32 %v901_v35, %v661_v47  ;;  %v1063_v49 = vpop.f32.mrb[3].mxu1 }
 0x1d9   : > { %751 = vst [vmem:[%s1555_s17 + $0x20] sm:$0xff] %v709_v48 }
 0x1da   : > { %v666_v50 = vpop.f32.mrb[4].mxu1 }
 0x1db   : > { %v710_v51 = vadd.f32 %v901_v35, %v666_v50  ;;  %v1066_v52 = vpop.f32.mrb[5].mxu1 }
 0x1dd   : > { %752 = vst [vmem:[%s1555_s17 + $0x28] sm:$0xff] %v710_v51 }
 0x1de   : > { %v671_v53 = vpop.f32.mrb[6].mxu1 }
 0x1df   : > { %v711_v54 = vadd.f32 %v901_v35, %v671_v53  ;;  %v1069_v55 = vpop.f32.mrb[7].mxu1 }
 0x1e1   : > { %753 = vst [vmem:[%s1555_s17 + $0x30] sm:$0xff] %v711_v54 }
 0x1e2   : > { %v676_v56 = vpop.f32.mrb[8].mxu1 }
 0x1e3   : > { %v712_v57 = vadd.f32 %v901_v35, %v676_v56  ;;  %v1072_v58 = vpop.f32.mrb[9].mxu1 }
 0x1e5   : > { %754 = vst [vmem:[%s1555_s17 + $0x38] sm:$0xff] %v712_v57 }
 0x1e6   : > { %v681_v59 = vpop.f32.mrb[10].mxu1 }
 0x1e7   : > { %v713_v60 = vadd.f32 %v901_v35, %v681_v59  ;;  %v1075_v61 = vpop.f32.mrb[11].mxu1 }
 0x1e9   : > { %755 = vst [vmem:[%s1555_s17 + $0x40] sm:$0xff] %v713_v60 }
 0x1ea   : > { %v686_v62 = vpop.f32.mrb[12].mxu1 }
 0x1eb   : > { %v714_v63 = vadd.f32 %v901_v35, %v686_v62  ;;  %v1078_v0 = vpop.f32.mrb[13].mxu1 }
 0x1ed   : > { %756 = vst [vmem:[%s1555_s17 + $0x48] sm:$0xff] %v714_v63 }
 0x1ee   : > { %v691_v1 = vpop.f32.mrb[14].mxu1 }
 0x1ef   : > { %v715_v2 = vadd.f32 %v901_v35, %v691_v1  ;;  %v1081_v3 = vpop.f32.mrb[15].mxu1 }
 0x1f1   : > { %757 = vst [vmem:[%s1555_s17 + $0x50] sm:$0xff] %v715_v2 }
 0x1f2   : > { %v696_v4 = vpop.f32.mrb[16].mxu1 }
 0x1f3   : > { %v716_v5 = vadd.f32 %v901_v35, %v696_v4  ;;  %v1084_v7 = vpop.f32.mrb[17].mxu1  ;;  %767 = sbr.rel (!%p1350_p4) target bundleno = 534 (0x216), region = 52 }
 0x1f5   : > { %758 = vst [vmem:[%s1555_s17 + $0x58] sm:$0xff] %v716_v5 }
 0x1f6   : > { %v701_v8 = vpop.f32.mrb[18].mxu1 }
 0x1f7   : > { %v717_v9 = vadd.f32 %v901_v35, %v701_v8  ;;  %v1087_v10 = vpop.f32.mrb[19].mxu1 }
 0x1f9   : > { %759 = vst [vmem:[%s1555_s17 + $0x60] sm:$0xff] %v717_v9 }
 0x1fa   : > { %s1654_s27 = smov (!%p770_p12, %s769_s27), 13 }
 0x1fb   : > { %s1577_s29 = sshll.u32 %s1654_s27, 7 }
 0x1fc   : > { %s774_s7 = ssub.s32 1664, %s1577_s29 }
 0x1fd   : > { %775 = vsyncadd %s1572_s25, %s774_s7  ;;  %p917_p13 = scmp.ne.s32.totalorder %s1577_s29, 0  ;;  %s923_s8 = smul.u32 1664, %s1264_s21 }
 0x1fe   : > { %s780_s9 = sshll.u32 %s1555_s17, 4  ;;  %s1277_s12 = smov [#allocation3]   ;;  %s1589_s9 = int_to_ptr.vmem [resolvable:$true] %s780_s9 }
 0x1ff   : > { %s1587_s11 = scalar_lea.hbm %s1643_s5, %s923_s8  ;;  %s1194_s15 = scalar_lea.vmem %s1589_s9, %s1577_s29 }
 0x200   : > { %p1195_p0 = scmp.ne.s32.totalorder %s1589_s9, %s1194_s15  ;;  %s1198_s24 = sshll.u32 %s1277_s12, 4  ;;  %s1199_s24 = int_to_ptr.vmem [resolvable:$false] %s1198_s24 }
 0x201   : > { %s1200_s21 = scalar_lea.vmem %s1199_s24, 3328  ;;  %p1201_p3 = scmp.lt.s32.totalorder %s1589_s9, %s1199_s24 }
 0x202   : > { %p1196_p1 = pnand %p1195_p0, %p917_p13  ;;  %p1202_p4 = scmp.lt.s32.totalorder %s1200_s21, %s1194_s15 }
 0x204   : > { %p1197_p2 = pneg %p1196_p1  ;;  %p1203_p5 = por %p1202_p4, %p1201_p3 }
 0x206   : > { %p1204_p6 = pnand %p1203_p5, %p1197_p2 }
 0x208   : > { %1207 = shalt.err (!%p1204_p6)
}
 0x209   : > { %s1208_s13 = scalar_lea.hbm %s1587_s11, %s1577_s29  ;;  %s1212_s17 = scalar_lea.hbm %s1643_s5, 3200 }
 0x20a   : > { %p1209_p7 = scmp.ne.s32.totalorder %s1587_s11, %s1208_s13  ;;  %p1213_p11 = scmp.lt.u32.totalorder %s1587_s11, %s1643_s5 }
 0x20b   : > { %p1214_p12 = scmp.lt.u32.totalorder %s1212_s17, %s1208_s13  ;;  %p1216_p1 = scmp.lt.u32.totalorder %s1208_s13, %s1587_s11 }
 0x20c   : > { %p1210_p9 = pnand %p1209_p7, %p917_p13 }
 0x20d   : > { %p1215_p0 = por %p1214_p12, %p1213_p11 }
 0x20e   : > { %p1211_p10 = pneg %p1210_p9 }
 0x20f   : > { %p1217_p2 = por %p1216_p1, %p1215_p0 }
 0x211   : > { %p1218_p3 = pnand %p1217_p2, %p1211_p10 }
 0x213   : > { %1221 = shalt.err (!%p1218_p3)
}
 0x214   : > { %s1278_s8 = smov 128   ;;  %s1279_s28 = smov 8  }
 0x215   : > { %786 = dma.vmem_to_hbm [thread:$0]  (%p917_p13), %s1589_s9, %s1577_s29, %s1587_s11, %s1572_s25, %s1278_s8, %s1278_s8, %s1279_s28  }
 0x216 PF: > { %p1140_p4 = scmp.ge.s32.totalorder %s1272_s23, 2  ;;  %s795_s10 = sand.u32 1, %s1252_s18  }
 0x217   : > { %s796_s15 = scalar_lea.sflag [#allocation4], %s795_s10 }
 0x218   : > { %p1137_p5 = pnand %p1140_p4, %p1357_p8 }
 0x21a   : > { %1247 = dma.done.wait (!%p1137_p5), %s796_s15, 1664  }
 0x21b   : > { %1249 = vsyncadd (!%p1137_p5), %s796_s15, 4294965632  ;;  %s18_s23 = sadd.s32 1, %s1272_s23   ;;  %s1646_s18 = smov %s1256_s19 }
 0x21c   : > { %p15_p6 = scmp.ge.s32.totalorder %s18_s23, 4   ;;  %s1647_s19 = smov %s1260_s20 }
 0x21d   : > { %s1648_s20 = smov %s1363_s6  ;;  %s1649_s21 = smov %s1268_s22 }
 0x21e   : > { %s1650_s22 = smov %s1652_s26  ;;  %17 = sbr.rel (!%p15_p6) target bundleno = 4 (0x4), region = 92 }
 0x225   :  { %801 = vsyncpa [#allocation4], 1 }
 0x226   :  { %803 = vsyncpa [#allocation4 + $0x1], 1 }

</bundles_post_ra>
